<compile_context>
chip_gen: v7x
topology: tpu7x:2x2x1
jax: 0.10.0
libtpu: 0.0.40
codegen_flags: <defaults>
</compile_context>

<pallas_src>
import jax
import jax.numpy as jnp
from jax import lax
from jax.experimental import pallas as pl
from jax.experimental.pallas import tpu as pltpu

IN_FEATURES = 16384
OUT_FEATURES = 10


def linear_logsoftmax_kernel(x_ref, w_ref, b_ref, o_ref):
    # x: (B, K) f32, w: (N, K) f32 (lane-dense, K on the lane axis), b: (1, N)
    logits = lax.dot_general(
        x_ref[...],
        w_ref[...],
        dimension_numbers=(((1,), (1,)), ((), ())),  # contract K with K
        preferred_element_type=jnp.float32,
    ) + b_ref[...]                                   # (B, N) + (1, N)

    # Numerically stable log-softmax over dim=1.
    m = jnp.max(logits, axis=1, keepdims=True)
    shifted = logits - m
    lse = jnp.log(jnp.sum(jnp.exp(shifted), axis=1, keepdims=True))
    o_ref[...] = (shifted - lse).astype(o_ref.dtype)


def derived_model2(x, w, b):
    """x: (B, 16384) f32, w: (10, 16384) f32 (PyTorch layout), b: (1, 10) f32
    -> (B, 10) f32 log-probabilities."""
    B, K = x.shape
    N, Kw = w.shape
    assert K == IN_FEATURES and Kw == IN_FEATURES and N == OUT_FEATURES

    cost = pl.CostEstimate(
        flops=2 * B * K * N,
        transcendentals=B * N,                       # exp in log-softmax
        bytes_accessed=(B * K + N * K + N + B * N) * 4,
    )

    return pl.pallas_call(
        linear_logsoftmax_kernel,
        out_shape=jax.ShapeDtypeStruct((B, N), jnp.float32),
        grid=(1,),                                   # single step: all resident
        in_specs=[
            pl.BlockSpec((B, K), lambda i: (0, 0)),  # x, whole array in VMEM
            pl.BlockSpec((N, K), lambda i: (0, 0)),  # w, lane-dense (10, 16384)
            pl.BlockSpec((1, N), lambda i: (0, 0)),  # bias
        ],
        out_specs=pl.BlockSpec((B, N), lambda i: (0, 0)),
        compiler_params=pltpu.CompilerParams(
            dimension_semantics=("arbitrary",),
        ),
        cost_estimate=cost,
    )(x, w, b)


def reference(x, w, b):
    logits = x @ w.T + b
    return jax.nn.log_softmax(logits, axis=1)


if __name__ == "__main__":
    key = jax.random.PRNGKey(0)
    kx, kw, kb = jax.random.split(key, 3)

    B = 8
    # nn.Linear default init: U(-1/sqrt(in_features), 1/sqrt(in_features)),
    # weight stored PyTorch-style as (out_features, in_features).
    bound = 1.0 / jnp.sqrt(jnp.float32(IN_FEATURES))
    w = jax.random.uniform(
        kw, (OUT_FEATURES, IN_FEATURES), jnp.float32, -bound, bound
    )
    b = jax.random.uniform(kb, (1, OUT_FEATURES), jnp.float32, -bound, bound)
    x = jax.random.normal(kx, (B, IN_FEATURES), jnp.float32)

    out = derived_model2(x, w, b)
    out = jax.block_until_ready(out)

    ref = reference(x, w, b)
    assert out.shape == (B, OUT_FEATURES)
    assert jnp.allclose(out, ref, atol=1e-4, rtol=1e-4), (
        f"max abs err {jnp.max(jnp.abs(out - ref))}"
    )
    print("KERNEL_OK")
</pallas_src>

<mosaic_0001>
module attributes {stable_mosaic.version = 11 : i64} {
  func.func @linear_logsoftmax_kernel(%arg0: i32, %arg1: memref<8x16384xf32, #tpu.memory_space<vmem>>, %arg2: memref<10x16384xf32, #tpu.memory_space<vmem>>, %arg3: memref<1x10xf32, #tpu.memory_space<vmem>>, %arg4: memref<8x10xf32, #tpu.memory_space<vmem>>) attributes {dimension_semantics = [#tpu.dimension_semantics<arbitrary>], iteration_bounds = array<i64: 1>, scalar_prefetch = 0 : i64, scratch_operands = 0 : i64, tpu.core_type = #tpu.core_type<tc>, window_params = [{pipeline_mode = #tpu.pipeline_mode<synchronous>, transform_indices = @transform_0, window_bounds = array<i64: 8, 16384>}, {pipeline_mode = #tpu.pipeline_mode<synchronous>, transform_indices = @transform_1, window_bounds = array<i64: 10, 16384>}, {pipeline_mode = #tpu.pipeline_mode<synchronous>, transform_indices = @transform_2, window_bounds = array<i64: 1, 10>}, {pipeline_mode = #tpu.pipeline_mode<synchronous>, transform_indices = @transform_3, window_bounds = array<i64: 8, 10>}]} {
    %c0 = arith.constant 0 : index
    %c0_0 = arith.constant 0 : index
    %0 = vector.load %arg1[%c0, %c0_0] : memref<8x16384xf32, #tpu.memory_space<vmem>>, vector<8x16384xf32>
    %c0_1 = arith.constant 0 : index
    %c0_2 = arith.constant 0 : index
    %1 = vector.load %arg2[%c0_1, %c0_2] : memref<10x16384xf32, #tpu.memory_space<vmem>>, vector<10x16384xf32>
    %cst = arith.constant dense<0.000000e+00> : vector<8x10xf32>
    %2 = tpu.matmul %0, %1, %cst {dimension_numbers = #tpu.dot_dimension_numbers<[1], [1], [0], [0], [0, 0, 1, 0], [], []>} : vector<8x16384xf32>, vector<10x16384xf32>, vector<8x10xf32> -> vector<8x10xf32>
    %c0_3 = arith.constant 0 : index
    %c0_4 = arith.constant 0 : index
    %3 = vector.load %arg3[%c0_3, %c0_4] : memref<1x10xf32, #tpu.memory_space<vmem>>, vector<1x10xf32>
    %4 = vector.broadcast %3 : vector<1x10xf32> to vector<8x10xf32>
    %5 = arith.addf %2, %4 : vector<8x10xf32>
    %cst_5 = arith.constant dense<0xFF800000> : vector<8xf32>
    %6 = vector.multi_reduction <maximumf>, %5, %cst_5 [1] : vector<8x10xf32> to vector<8xf32>
    %7 = vector.shape_cast %6 : vector<8xf32> to vector<8x1xf32>
    %8 = vector.broadcast %7 : vector<8x1xf32> to vector<8x10xf32>
    %9 = arith.subf %5, %8 : vector<8x10xf32>
    %10 = math.exp %9 : vector<8x10xf32>
    %cst_6 = arith.constant dense<0.000000e+00> : vector<8xf32>
    %11 = vector.multi_reduction <add>, %10, %cst_6 [1] : vector<8x10xf32> to vector<8xf32>
    %12 = vector.shape_cast %11 : vector<8xf32> to vector<8x1xf32>
    %13 = math.log %12 : vector<8x1xf32>
    %14 = vector.broadcast %13 : vector<8x1xf32> to vector<8x10xf32>
    %15 = arith.subf %9, %14 : vector<8x10xf32>
    %c0_7 = arith.constant 0 : index
    %c0_8 = arith.constant 0 : index
    %16 = vector.load %arg4[%c0_7, %c0_8] : memref<8x10xf32, #tpu.memory_space<vmem>>, vector<8x10xf32>
    tpu.vector_store %arg4[%c0_7, %c0_8], %15 {strides = array<i32>} : memref<8x10xf32, #tpu.memory_space<vmem>>, vector<8x10xf32>,
    return
  }
  func.func @transform_0(%arg0: i32) -> (i32, i32) {
    %c0_i32 = arith.constant 0 : i32
    %c0_i32_0 = arith.constant 0 : i32
    %c0_i32_1 = arith.constant 0 : i32
    return %c0_i32, %c0_i32_0 : i32, i32
  }
  func.func @transform_1(%arg0: i32) -> (i32, i32) {
    %c0_i32 = arith.constant 0 : i32
    %c0_i32_0 = arith.constant 0 : i32
    %c0_i32_1 = arith.constant 0 : i32
    return %c0_i32, %c0_i32_0 : i32, i32
  }
  func.func @transform_2(%arg0: i32) -> (i32, i32) {
    %c0_i32 = arith.constant 0 : i32
    %c0_i32_0 = arith.constant 0 : i32
    %c0_i32_1 = arith.constant 0 : i32
    return %c0_i32, %c0_i32_0 : i32, i32
  }
  func.func @transform_3(%arg0: i32) -> (i32, i32) {
    %c0_i32 = arith.constant 0 : i32
    %c0_i32_0 = arith.constant 0 : i32
    %c0_i32_1 = arith.constant 0 : i32
    return %c0_i32, %c0_i32_0 : i32, i32
  }
}

</mosaic_0001>

<bundles_post_ra>
// kernel: tpu_custom_call.1
= control target key start
LH: loop header
LB: loop body
LE: loop exit
PB: predicated region body
PF: predicated region fallthrough
CT: control target
= control target key end

     0   :  { %8 = vsyncpa [#allocation3], 0  ;;  %s5480_s0 = inlined_call_operand.hbm [shape: f32[8,16384], index: 0, kind: input, shape index: {}]   ;;  %s5481_s1 = inlined_call_operand.hbm [shape: f32[10,16384], index: 1, kind: input, shape index: {}]   ;;  %s5482_s2 = inlined_call_operand.vmem [shape: f32[1,10], index: 2, kind: input, shape index: {}]   ;;  %s5483_s3 = inlined_call_operand.hbm [shape: f32[8,10], index: 3, kind: output, shape index: {}]  }
   0x1   :  { %9 = vsyncpa [#allocation6], 0 }
   0x2   :  { %10 = vsyncpa [#allocation4], 0  ;;  %s5406_s12 = smov [#allocation2]   ;;  %s5407_s14 = smov [#allocation5]  }
   0x3   :  { %s17_s13 = sshll.u32 %s5406_s12, 4  ;;  %s26_s15 = sshll.u32 %s5407_s14, 4  ;;  %s18_s13 = int_to_ptr.vmem [resolvable:$true] %s17_s13  ;;  %s5431_s15 = int_to_ptr.vmem [resolvable:$true] %s26_s15 }
   0x4   :  { %s5334_s18 = scalar_lea.hbm %s5480_s0, 16384 }
   0x5   :  { %p5335_p0 = scmp.ne.s32.totalorder %s5480_s0, %s5334_s18  ;;  %p5338_p1 = scmp.lt.u32.totalorder %s5334_s18, %s5480_s0 }
   0x7   :  { %p5340_p2 = pnand %p5338_p1, %p5335_p0 }
   0x9   :  { %5343 = shalt.err (!%p5340_p2)
}
   0xa   :  { %s5344_s23 = scalar_lea.vmem %s18_s13, 16384  ;;  %p5349_p4 = scmp.lt.s32.totalorder %s18_s13, %s18_s13 }
   0xb   :  { %p5345_p3 = scmp.ne.s32.totalorder %s18_s13, %s5344_s23  ;;  %p5350_p5 = scmp.lt.s32.totalorder %s5344_s23, %s5344_s23 }
   0xd   :  { %p5351_p6 = por %p5350_p5, %p5349_p4 }
   0xf   :  { %p5352_p7 = pnand %p5351_p6, %p5345_p3 }
  0x11   :  { %5355 = shalt.err (!%p5352_p7)
}
  0x12   :  { %20 = dma.hbm_to_vmem [thread:$0]  %s5480_s0, 16384, %s18_s13, [#allocation3]  }
  0x13   :  { %s5356_s28 = scalar_lea.hbm %s5481_s1, 32768 }
  0x14   :  { %p5357_p8 = scmp.ne.s32.totalorder %s5481_s1, %s5356_s28  ;;  %p5360_p9 = scmp.lt.u32.totalorder %s5356_s28, %s5481_s1 }
  0x16   :  { %p5362_p10 = pnand %p5360_p9, %p5357_p8 }
  0x18   :  { %5365 = shalt.err (!%p5362_p10)
}
  0x19   :  { %s5366_s6 = scalar_lea.vmem %s5431_s15, 32768  ;;  %p5371_p12 = scmp.lt.s32.totalorder %s5431_s15, %s5431_s15 }
  0x1a   :  { %p5367_p11 = scmp.ne.s32.totalorder %s5431_s15, %s5366_s6  ;;  %p5372_p13 = scmp.lt.s32.totalorder %s5366_s6, %s5366_s6 }
  0x1c   :  { %p5373_p0 = por %p5372_p13, %p5371_p12 }
  0x1e   :  { %p5374_p1 = pnand %p5373_p0, %p5367_p11 }
  0x20   :  { %5377 = shalt.err (!%p5374_p1)
}
  0x21   :  { %s5408_s0 = smov 16384   ;;  %s5409_s7 = smov 1024  }
  0x22   :  { %32 = dma.hbm_to_vmem [thread:$0]  %s5481_s1, 32768, %s5431_s15, [#allocation6], %s5408_s0, %s5408_s0, %s5409_s7  }
  0x23   :  { %5400 = dma.done.wait [#allocation3], 16384  }
  0x24   :  { %5401 = vsyncadd [#allocation3], 4294950912 }
  0x25   :  { %5402 = dma.done.wait [#allocation6], 32768  }
  0x26   :  { %5403 = vsyncadd [#allocation6], 4294934528  ;;  %v170_v0 = vld [vmem:[#allocation5 + $0x8] sm:$0xff]  ;;  %v169_v5 = vld [vmem:[#allocation5] sm:$0xff]  ;;  %vm4912_vm0 = vcmask 80896  }
  0x27   :  { %v298_v1 = vld [vmem:[#allocation5 + $0x408] sm:$0x3]  ;;  %v297_v6 = vld [vmem:[#allocation5 + $0x400] sm:$0x3]  ;;  %v172_v14 = vld [vmem:[#allocation5 + $0x18] sm:$0xff] }
  0x28   :  { %v234_v2 = vld [vmem:[#allocation5 + $0x208] sm:$0xff]  ;;  %v4943_v3 = vpack.c.bf16 %v298_v1, %v170_v0  ;;  %v4945_v8 = vpack.c.bf16 %v297_v6, %v169_v5  ;;  %v233_v9 = vld [vmem:[#allocation5 + $0x200] sm:$0xff]  ;;  %v300_v15 = vld [vmem:[#allocation5 + $0x418] sm:$0x3] }
  0x29   :  { %v362_v4 = vld [vmem:[#allocation5 + $0x608] sm:$0x3]  ;;  %v361_v10 = vld [vmem:[#allocation5 + $0x600] sm:$0x3]  ;;  %v236_v16 = vld [vmem:[#allocation5 + $0x218] sm:$0xff]  ;;  %v4947_v17 = vpack.c.bf16 %v300_v15, %v172_v14 }
  0x2a   :  { %v5071_v7 = vpack.c.bf16 %v362_v4, %v234_v2  ;;  %v42_v11 = vld [vmem:[#allocation2 + $0x8] sm:$0xff]  ;;  %4944 = vmatprep.subr.bf16.mxu1 %v4943_v3  ;;  %v5073_v12 = vpack.c.bf16 %v361_v10, %v233_v9  ;;  %v364_v18 = vld [vmem:[#allocation5 + $0x618] sm:$0x3]  ;;  %v171_v19 = vld [vmem:[#allocation5 + $0x10] sm:$0xff] }
  0x2b   :  { %496 = vmatprep.mubr.f32.mxu1 %v42_v11  ;;  %v106_v13 = vld [vmem:[#allocation2 + $0x208] sm:$0xff]  ;;  %4946 = vmatpush1.bf16.xpose.msra.mxu1 %v4945_v8  ;;  %v299_v20 = vld [vmem:[#allocation5 + $0x410] sm:$0x3]  ;;  %v5075_v21 = vpack.c.bf16 %v364_v18, %v236_v16  ;;  %v41_v25 = vld [vmem:[#allocation2] sm:$0xff] }
  0x2c   :  { %5072 = vmatprep.subr.bf16.mxu0 %v5071_v7  ;;  %2736 = vmatprep.mubr.f32.mxu0 %v106_v13  ;;  %v235_v22 = vld [vmem:[#allocation5 + $0x210] sm:$0xff]  ;;  %v174_v24 = vld [vmem:[#allocation5 + $0x28] sm:$0xff]  ;;  %v4949_v26 = vpack.c.bf16 %v299_v20, %v171_v19  ;;  %v105_v29 = vld [vmem:[#allocation2 + $0x200] sm:$0xff] }
  0x2d   :  { %5074 = vmatpush1.bf16.xpose.msra.mxu0 %v5073_v12  ;;  %v363_v23 = vld [vmem:[#allocation5 + $0x610] sm:$0x3]  ;;  %4948 = vmatprep.subr.bf16.mxu1 %v4947_v17  ;;  %v302_v27 = vld [vmem:[#allocation5 + $0x428] sm:$0x3]  ;;  %v44_v32 = vld [vmem:[#allocation2 + $0x18] sm:$0xff] }
  0x2e   :  { %5076 = vmatprep.subr.bf16.mxu0 %v5075_v21  ;;  %v238_v28 = vld [vmem:[#allocation5 + $0x228] sm:$0xff]  ;;  %v5077_v30 = vpack.c.bf16 %v363_v23, %v235_v22  ;;  %v4951_v33 = vpack.c.bf16 %v302_v27, %v174_v24  ;;  %v108_v34 = vld [vmem:[#allocation2 + $0x218] sm:$0xff]  ;;  %v173_v36 = vld [vmem:[#allocation5 + $0x20] sm:$0xff] }
  0x2f   :  { %v366_v31 = vld [vmem:[#allocation5 + $0x628] sm:$0x3]  ;;  %v301_v37 = vld [vmem:[#allocation5 + $0x420] sm:$0x3]  ;;  %v176_v40 = vld [vmem:[#allocation5 + $0x38] sm:$0xff] }
  0x30   :  { %v5079_v35 = vpack.c.bf16 %v366_v31, %v238_v28  ;;  %v237_v38 = vld [vmem:[#allocation5 + $0x220] sm:$0xff]  ;;  %v304_v41 = vld [vmem:[#allocation5 + $0x438] sm:$0x3]  ;;  %v43_v42 = vld [vmem:[#allocation2 + $0x10] sm:$0xff]  ;;  %v4953_v43 = vpack.c.bf16 %v301_v37, %v173_v36 }
  0x31   :  { %v365_v39 = vld [vmem:[#allocation5 + $0x620] sm:$0x3]  ;;  %v240_v44 = vld [vmem:[#allocation5 + $0x238] sm:$0xff]  ;;  %v107_v46 = vld [vmem:[#allocation2 + $0x210] sm:$0xff]  ;;  %v4955_v49 = vpack.c.bf16 %v304_v41, %v176_v40 }
  0x32   :  { %497 = vmatmul.mubr.f32.vlgmr.msra.gmra.mrb[0].mxu1 %v41_v25  ;;  %v368_v45 = vld [vmem:[#allocation5 + $0x638] sm:$0x3]  ;;  %v5081_v47 = vpack.c.bf16 %v365_v39, %v237_v38  ;;  %v46_v48 = vld [vmem:[#allocation2 + $0x28] sm:$0xff]  ;;  %v175_v52 = vld [vmem:[#allocation5 + $0x30] sm:$0xff] }
  0x33   :  { %4950 = vmatpush1.bf16.xpose.msra.mxu1 %v4949_v26  ;;  %566 = vmatprep.mubr.f32.mxu1 %v44_v32  ;;  %v110_v50 = vld [vmem:[#allocation2 + $0x228] sm:$0xff]  ;;  %v5083_v51 = vpack.c.bf16 %v368_v45, %v240_v44  ;;  %v303_v53 = vld [vmem:[#allocation5 + $0x430] sm:$0x3]  ;;  %v45_v58 = vld [vmem:[#allocation2 + $0x20] sm:$0xff] }
  0x34   :  { %2737 = vmatmul.mubr.f32.vlgmr.msra.gmra.mrb[0].mxu0 %v105_v29  ;;  %4952 = vmatprep.subr.bf16.mxu1 %v4951_v33  ;;  %v239_v54 = vld [vmem:[#allocation5 + $0x230] sm:$0xff]  ;;  %v178_v56 = vld [vmem:[#allocation5 + $0x48] sm:$0xff]  ;;  %v4957_v59 = vpack.c.bf16 %v303_v53, %v175_v52  ;;  %v109_v62 = vld [vmem:[#allocation2 + $0x220] sm:$0xff] }
  0x35   :  { %5078 = vmatpush1.bf16.xpose.msra.mxu0 %v5077_v30  ;;  %2806 = vmatprep.mubr.f32.mxu0 %v108_v34  ;;  %v367_v55 = vld [vmem:[#allocation5 + $0x630] sm:$0x3]  ;;  %v306_v57 = vld [vmem:[#allocation5 + $0x448] sm:$0x3]  ;;  %v48_v0 = vld [vmem:[#allocation2 + $0x38] sm:$0xff] }
  0x36   :  { %5080 = vmatprep.subr.bf16.mxu0 %v5079_v35  ;;  %v242_v60 = vld [vmem:[#allocation5 + $0x248] sm:$0xff]  ;;  %v5085_v63 = vpack.c.bf16 %v367_v55, %v239_v54  ;;  %v4959_v1 = vpack.c.bf16 %v306_v57, %v178_v56  ;;  %v112_v2 = vld [vmem:[#allocation2 + $0x238] sm:$0xff]  ;;  %v177_v4 = vld [vmem:[#allocation5 + $0x40] sm:$0xff] }
  0x37   :  { %v370_v61 = vld [vmem:[#allocation5 + $0x648] sm:$0x3]  ;;  %v305_v5 = vld [vmem:[#allocation5 + $0x440] sm:$0x3]  ;;  %v180_v8 = vld [vmem:[#allocation5 + $0x58] sm:$0xff] }
  0x38   :  { %v5087_v3 = vpack.c.bf16 %v370_v61, %v242_v60  ;;  %v241_v6 = vld [vmem:[#allocation5 + $0x240] sm:$0xff]  ;;  %v308_v9 = vld [vmem:[#allocation5 + $0x458] sm:$0x3]  ;;  %v47_v10 = vld [vmem:[#allocation2 + $0x30] sm:$0xff]  ;;  %v4961_v11 = vpack.c.bf16 %v305_v5, %v177_v4 }
  0x39   :  { %v369_v7 = vld [vmem:[#allocation5 + $0x640] sm:$0x3]  ;;  %v244_v12 = vld [vmem:[#allocation5 + $0x258] sm:$0xff]  ;;  %v111_v14 = vld [vmem:[#allocation2 + $0x230] sm:$0xff]  ;;  %v4963_v17 = vpack.c.bf16 %v308_v9, %v180_v8 }
  0x3a   :  { %567 = vmatmul.mubr.f32.vlgmr.msra.gmra.mrb[0].mxu1 %v43_v42  ;;  %v372_v13 = vld [vmem:[#allocation5 + $0x658] sm:$0x3]  ;;  %v5089_v15 = vpack.c.bf16 %v369_v7, %v241_v6  ;;  %v50_v16 = vld [vmem:[#allocation2 + $0x48] sm:$0xff]  ;;  %v179_v20 = vld [vmem:[#allocation5 + $0x50] sm:$0xff] }
  0x3b   :  { %4954 = vmatpush1.bf16.xpose.msra.mxu1 %v4953_v43  ;;  %636 = vmatprep.mubr.f32.mxu1 %v46_v48  ;;  %v114_v18 = vld [vmem:[#allocation2 + $0x248] sm:$0xff]  ;;  %v5091_v19 = vpack.c.bf16 %v372_v13, %v244_v12  ;;  %v307_v21 = vld [vmem:[#allocation5 + $0x450] sm:$0x3]  ;;  %v49_v26 = vld [vmem:[#allocation2 + $0x40] sm:$0xff] }
  0x3c   :  { %2807 = vmatmul.mubr.f32.vlgmr.msra.gmra.mrb[0].mxu0 %v107_v46  ;;  %4956 = vmatprep.subr.bf16.mxu1 %v4955_v49  ;;  %v243_v22 = vld [vmem:[#allocation5 + $0x250] sm:$0xff]  ;;  %v182_v24 = vld [vmem:[#allocation5 + $0x68] sm:$0xff]  ;;  %v4965_v27 = vpack.c.bf16 %v307_v21, %v179_v20  ;;  %v113_v30 = vld [vmem:[#allocation2 + $0x240] sm:$0xff] }
  0x3d   :  { %5082 = vmatpush1.bf16.xpose.msra.mxu0 %v5081_v47  ;;  %2876 = vmatprep.mubr.f32.mxu0 %v110_v50  ;;  %v371_v23 = vld [vmem:[#allocation5 + $0x650] sm:$0x3]  ;;  %v310_v25 = vld [vmem:[#allocation5 + $0x468] sm:$0x3]  ;;  %v52_v32 = vld [vmem:[#allocation2 + $0x58] sm:$0xff] }
  0x3e   :  { %5084 = vmatprep.subr.bf16.mxu0 %v5083_v51  ;;  %v246_v28 = vld [vmem:[#allocation5 + $0x268] sm:$0xff]  ;;  %v5093_v31 = vpack.c.bf16 %v371_v23, %v243_v22  ;;  %v4967_v33 = vpack.c.bf16 %v310_v25, %v182_v24  ;;  %v116_v34 = vld [vmem:[#allocation2 + $0x258] sm:$0xff]  ;;  %v181_v36 = vld [vmem:[#allocation5 + $0x60] sm:$0xff] }
  0x3f   :  { %v374_v29 = vld [vmem:[#allocation5 + $0x668] sm:$0x3]  ;;  %v309_v37 = vld [vmem:[#allocation5 + $0x460] sm:$0x3]  ;;  %v184_v40 = vld [vmem:[#allocation5 + $0x78] sm:$0xff] }
  0x40   :  { %v5095_v35 = vpack.c.bf16 %v374_v29, %v246_v28  ;;  %v245_v38 = vld [vmem:[#allocation5 + $0x260] sm:$0xff]  ;;  %v312_v41 = vld [vmem:[#allocation5 + $0x478] sm:$0x3]  ;;  %v51_v42 = vld [vmem:[#allocation2 + $0x50] sm:$0xff]  ;;  %v4969_v43 = vpack.c.bf16 %v309_v37, %v181_v36 }
  0x41   :  { %v373_v39 = vld [vmem:[#allocation5 + $0x660] sm:$0x3]  ;;  %v248_v44 = vld [vmem:[#allocation5 + $0x278] sm:$0xff]  ;;  %v115_v46 = vld [vmem:[#allocation2 + $0x250] sm:$0xff]  ;;  %v4971_v49 = vpack.c.bf16 %v312_v41, %v184_v40 }
  0x42   :  { %637 = vmatmul.mubr.f32.vlgmr.msra.gmra.mrb[0].mxu1 %v45_v58  ;;  %v376_v45 = vld [vmem:[#allocation5 + $0x678] sm:$0x3]  ;;  %v5097_v47 = vpack.c.bf16 %v373_v39, %v245_v38  ;;  %v54_v48 = vld [vmem:[#allocation2 + $0x68] sm:$0xff]  ;;  %v183_v52 = vld [vmem:[#allocation5 + $0x70] sm:$0xff] }
  0x43   :  { %4958 = vmatpush1.bf16.xpose.msra.mxu1 %v4957_v59  ;;  %706 = vmatprep.mubr.f32.mxu1 %v48_v0  ;;  %v118_v50 = vld [vmem:[#allocation2 + $0x268] sm:$0xff]  ;;  %v5099_v51 = vpack.c.bf16 %v376_v45, %v248_v44  ;;  %v311_v53 = vld [vmem:[#allocation5 + $0x470] sm:$0x3]  ;;  %v53_v58 = vld [vmem:[#allocation2 + $0x60] sm:$0xff] }
  0x44   :  { %2877 = vmatmul.mubr.f32.vlgmr.msra.gmra.mrb[0].mxu0 %v109_v62  ;;  %4960 = vmatprep.subr.bf16.mxu1 %v4959_v1  ;;  %v247_v54 = vld [vmem:[#allocation5 + $0x270] sm:$0xff]  ;;  %v186_v56 = vld [vmem:[#allocation5 + $0x88] sm:$0xff]  ;;  %v4973_v59 = vpack.c.bf16 %v311_v53, %v183_v52  ;;  %v117_v62 = vld [vmem:[#allocation2 + $0x260] sm:$0xff] }
  0x45   :  { %5086 = vmatpush1.bf16.xpose.msra.mxu0 %v5085_v63  ;;  %2946 = vmatprep.mubr.f32.mxu0 %v112_v2  ;;  %v375_v55 = vld [vmem:[#allocation5 + $0x670] sm:$0x3]  ;;  %v314_v57 = vld [vmem:[#allocation5 + $0x488] sm:$0x3]  ;;  %v56_v0 = vld [vmem:[#allocation2 + $0x78] sm:$0xff] }
  0x46   :  { %5088 = vmatprep.subr.bf16.mxu0 %v5087_v3  ;;  %v250_v60 = vld [vmem:[#allocation5 + $0x288] sm:$0xff]  ;;  %v5101_v63 = vpack.c.bf16 %v375_v55, %v247_v54  ;;  %v4975_v1 = vpack.c.bf16 %v314_v57, %v186_v56  ;;  %v120_v2 = vld [vmem:[#allocation2 + $0x278] sm:$0xff]  ;;  %v185_v4 = vld [vmem:[#allocation5 + $0x80] sm:$0xff] }
  0x47   :  { %v378_v61 = vld [vmem:[#allocation5 + $0x688] sm:$0x3]  ;;  %v313_v5 = vld [vmem:[#allocation5 + $0x480] sm:$0x3]  ;;  %v188_v8 = vld [vmem:[#allocation5 + $0x98] sm:$0xff] }
  0x48   :  { %v5103_v3 = vpack.c.bf16 %v378_v61, %v250_v60  ;;  %v249_v6 = vld [vmem:[#allocation5 + $0x280] sm:$0xff]  ;;  %v316_v9 = vld [vmem:[#allocation5 + $0x498] sm:$0x3]  ;;  %v187_v20 = vld [vmem:[#allocation5 + $0x90] sm:$0xff] }
  0x49   :  { %v377_v7 = vld [vmem:[#allocation5 + $0x680] sm:$0x3]  ;;  %v252_v12 = vld [vmem:[#allocation5 + $0x298] sm:$0xff]  ;;  %v315_v21 = vld [vmem:[#allocation5 + $0x490] sm:$0x3] }
  0x4a   :  { %707 = vmatmul.mubr.f32.vlgmr.msra.gmra.mrb[0].mxu1 %v47_v10  ;;  %v55_v10 = vld [vmem:[#allocation2 + $0x70] sm:$0xff]  ;;  %v380_v13 = vld [vmem:[#allocation5 + $0x698] sm:$0x3]  ;;  %v190_v24 = vld [vmem:[#allocation5 + $0xa8] sm:$0xff] }
  0x4b   :  { %4962 = vmatpush1.bf16.xpose.msra.mxu1 %v4961_v11  ;;  %776 = vmatprep.mubr.f32.mxu1 %v50_v16  ;;  %v4977_v11 = vpack.c.bf16 %v313_v5, %v185_v4  ;;  %v58_v16 = vld [vmem:[#allocation2 + $0x88] sm:$0xff]  ;;  %v251_v22 = vld [vmem:[#allocation5 + $0x290] sm:$0xff]  ;;  %v189_v36 = vld [vmem:[#allocation5 + $0xa0] sm:$0xff] }
  0x4c   :  { %2947 = vmatmul.mubr.f32.vlgmr.msra.gmra.mrb[0].mxu0 %v111_v14  ;;  %4964 = vmatprep.subr.bf16.mxu1 %v4963_v17  ;;  %v119_v14 = vld [vmem:[#allocation2 + $0x270] sm:$0xff]  ;;  %v4979_v17 = vpack.c.bf16 %v316_v9, %v188_v8  ;;  %v318_v25 = vld [vmem:[#allocation5 + $0x4a8] sm:$0x3]  ;;  %v317_v37 = vld [vmem:[#allocation5 + $0x4a0] sm:$0x3] }
  0x4d   :  { %5090 = vmatpush1.bf16.xpose.msra.mxu0 %v5089_v15  ;;  %3016 = vmatprep.mubr.f32.mxu0 %v114_v18  ;;  %v5105_v15 = vpack.c.bf16 %v377_v7, %v249_v6  ;;  %v122_v18 = vld [vmem:[#allocation2 + $0x288] sm:$0xff]  ;;  %v379_v23 = vld [vmem:[#allocation5 + $0x690] sm:$0x3]  ;;  %v253_v38 = vld [vmem:[#allocation5 + $0x2a0] sm:$0xff] }
  0x4e   :  { %5092 = vmatprep.subr.bf16.mxu0 %v5091_v19  ;;  %v5107_v19 = vpack.c.bf16 %v380_v13, %v252_v12  ;;  %v254_v28 = vld [vmem:[#allocation5 + $0x2a8] sm:$0xff]  ;;  %v381_v39 = vld [vmem:[#allocation5 + $0x6a0] sm:$0x3]  ;;  %v192_v40 = vld [vmem:[#allocation5 + $0xb8] sm:$0xff] }
  0x4f   :  { %v382_v29 = vld [vmem:[#allocation5 + $0x6a8] sm:$0x3]  ;;  %v320_v41 = vld [vmem:[#allocation5 + $0x4b8] sm:$0x3]  ;;  %v191_v52 = vld [vmem:[#allocation5 + $0xb0] sm:$0xff] }
  0x50   :  { %v256_v44 = vld [vmem:[#allocation5 + $0x2b8] sm:$0xff]  ;;  %v319_v53 = vld [vmem:[#allocation5 + $0x4b0] sm:$0x3]  ;;  %v194_v56 = vld [vmem:[#allocation5 + $0xc8] sm:$0xff] }
  0x51   :  { %v384_v45 = vld [vmem:[#allocation5 + $0x6b8] sm:$0x3]  ;;  %v255_v54 = vld [vmem:[#allocation5 + $0x2b0] sm:$0xff]  ;;  %v322_v57 = vld [vmem:[#allocation5 + $0x4c8] sm:$0x3] }
  0x52   :  { %777 = vmatmul.mubr.f32.vlgmr.msra.gmra.mrb[0].mxu1 %v49_v26  ;;  %v57_v26 = vld [vmem:[#allocation2 + $0x80] sm:$0xff]  ;;  %v383_v55 = vld [vmem:[#allocation5 + $0x6b0] sm:$0x3]  ;;  %v258_v60 = vld [vmem:[#allocation5 + $0x2c8] sm:$0xff] }
  0x53   :  { %4966 = vmatpush1.bf16.xpose.msra.mxu1 %v4965_v27  ;;  %846 = vmatprep.mubr.f32.mxu1 %v52_v32  ;;  %v4981_v27 = vpack.c.bf16 %v315_v21, %v187_v20  ;;  %v60_v32 = vld [vmem:[#allocation2 + $0x98] sm:$0xff]  ;;  %v386_v61 = vld [vmem:[#allocation5 + $0x6c8] sm:$0x3]  ;;  %v193_v4 = vld [vmem:[#allocation5 + $0xc0] sm:$0xff] }
  0x54   :  { %3017 = vmatmul.mubr.f32.vlgmr.msra.gmra.mrb[0].mxu0 %v113_v30  ;;  %4968 = vmatprep.subr.bf16.mxu1 %v4967_v33  ;;  %v121_v30 = vld [vmem:[#allocation2 + $0x280] sm:$0xff]  ;;  %v4983_v33 = vpack.c.bf16 %v318_v25, %v190_v24  ;;  %v196_v8 = vld [vmem:[#allocation5 + $0xd8] sm:$0xff]  ;;  %v195_v20 = vld [vmem:[#allocation5 + $0xd0] sm:$0xff] }
  0x55   :  { %5094 = vmatpush1.bf16.xpose.msra.mxu0 %v5093_v31  ;;  %3086 = vmatprep.mubr.f32.mxu0 %v116_v34  ;;  %v5109_v31 = vpack.c.bf16 %v379_v23, %v251_v22  ;;  %v124_v34 = vld [vmem:[#allocation2 + $0x298] sm:$0xff]  ;;  %v321_v5 = vld [vmem:[#allocation5 + $0x4c0] sm:$0x3]  ;;  %v323_v21 = vld [vmem:[#allocation5 + $0x4d0] sm:$0x3] }
  0x56   :  { %5096 = vmatprep.subr.bf16.mxu0 %v5095_v35  ;;  %v5111_v35 = vpack.c.bf16 %v382_v29, %v254_v28  ;;  %v257_v6 = vld [vmem:[#allocation5 + $0x2c0] sm:$0xff]  ;;  %v324_v9 = vld [vmem:[#allocation5 + $0x4d8] sm:$0x3]  ;;  %v259_v22 = vld [vmem:[#allocation5 + $0x2d0] sm:$0xff] }
  0x57   :  { %v385_v7 = vld [vmem:[#allocation5 + $0x6c0] sm:$0x3]  ;;  %v260_v12 = vld [vmem:[#allocation5 + $0x2d8] sm:$0xff]  ;;  %v387_v23 = vld [vmem:[#allocation5 + $0x6d0] sm:$0x3] }
  0x58   :  { %v388_v13 = vld [vmem:[#allocation5 + $0x6d8] sm:$0x3]  ;;  %v198_v24 = vld [vmem:[#allocation5 + $0xe8] sm:$0xff] }
  0x59   :  { %v326_v25 = vld [vmem:[#allocation5 + $0x4e8] sm:$0x3] }
  0x5a   :  { %847 = vmatmul.mubr.f32.vlgmr.msra.gmra.mrb[0].mxu1 %v51_v42  ;;  %v59_v42 = vld [vmem:[#allocation2 + $0x90] sm:$0xff]  ;;  %v262_v28 = vld [vmem:[#allocation5 + $0x2e8] sm:$0xff] }
  0x5b   :  { %4970 = vmatpush1.bf16.xpose.msra.mxu1 %v4969_v43  ;;  %916 = vmatprep.mubr.f32.mxu1 %v54_v48  ;;  %v4985_v43 = vpack.c.bf16 %v317_v37, %v189_v36  ;;  %v62_v48 = vld [vmem:[#allocation2 + $0xa8] sm:$0xff]  ;;  %v197_v36 = vld [vmem:[#allocation5 + $0xe0] sm:$0xff] }
  0x5c   :  { %3087 = vmatmul.mubr.f32.vlgmr.msra.gmra.mrb[0].mxu0 %v115_v46  ;;  %4972 = vmatprep.subr.bf16.mxu1 %v4971_v49  ;;  %v123_v46 = vld [vmem:[#allocation2 + $0x290] sm:$0xff]  ;;  %v4987_v49 = vpack.c.bf16 %v320_v41, %v192_v40  ;;  %v390_v29 = vld [vmem:[#allocation5 + $0x6e8] sm:$0x3]  ;;  %v325_v37 = vld [vmem:[#allocation5 + $0x4e0] sm:$0x3] }
  0x5d   :  { %5098 = vmatpush1.bf16.xpose.msra.mxu0 %v5097_v47  ;;  %3156 = vmatprep.mubr.f32.mxu0 %v118_v50  ;;  %v5113_v47 = vpack.c.bf16 %v381_v39, %v253_v38  ;;  %v126_v50 = vld [vmem:[#allocation2 + $0x2a8] sm:$0xff]  ;;  %v261_v38 = vld [vmem:[#allocation5 + $0x2e0] sm:$0xff]  ;;  %v200_v40 = vld [vmem:[#allocation5 + $0xf8] sm:$0xff] }
  0x5e   :  { %5100 = vmatprep.subr.bf16.mxu0 %v5099_v51  ;;  %v5115_v51 = vpack.c.bf16 %v384_v45, %v256_v44  ;;  %v389_v39 = vld [vmem:[#allocation5 + $0x6e0] sm:$0x3]  ;;  %v328_v41 = vld [vmem:[#allocation5 + $0x4f8] sm:$0x3] }
  0x5f   :  { %v264_v44 = vld [vmem:[#allocation5 + $0x2f8] sm:$0xff] }
  0x60   :  { %v392_v45 = vld [vmem:[#allocation5 + $0x6f8] sm:$0x3] }
  0x62   :  { %917 = vmatmul.mubr.f32.vlgmr.msra.gmra.mrb[0].mxu1 %v53_v58  ;;  %v61_v58 = vld [vmem:[#allocation2 + $0xa0] sm:$0xff] }
  0x63   :  { %4974 = vmatpush1.bf16.xpose.msra.mxu1 %v4973_v59  ;;  %986 = vmatprep.mubr.f32.mxu1 %v56_v0  ;;  %v4989_v59 = vpack.c.bf16 %v319_v53, %v191_v52  ;;  %v64_v0 = vld [vmem:[#allocation2 + $0xb8] sm:$0xff]  ;;  %v199_v52 = vld [vmem:[#allocation5 + $0xf0] sm:$0xff] }
  0x64   :  { %3157 = vmatmul.mubr.f32.vlgmr.msra.gmra.mrb[0].mxu0 %v117_v62  ;;  %4976 = vmatprep.subr.bf16.mxu1 %v4975_v1  ;;  %v125_v62 = vld [vmem:[#allocation2 + $0x2a0] sm:$0xff]  ;;  %v4991_v1 = vpack.c.bf16 %v322_v57, %v194_v56  ;;  %v327_v53 = vld [vmem:[#allocation5 + $0x4f0] sm:$0x3]  ;;  %v202_v56 = vld [vmem:[#allocation5 + $0x108] sm:$0xff] }
  0x65   :  { %5102 = vmatpush1.bf16.xpose.msra.mxu0 %v5101_v63  ;;  %3226 = vmatprep.mubr.f32.mxu0 %v120_v2  ;;  %v5117_v63 = vpack.c.bf16 %v383_v55, %v255_v54  ;;  %v128_v2 = vld [vmem:[#allocation2 + $0x2b8] sm:$0xff]  ;;  %v263_v54 = vld [vmem:[#allocation5 + $0x2f0] sm:$0xff]  ;;  %v330_v57 = vld [vmem:[#allocation5 + $0x508] sm:$0x3] }
  0x66   :  { %5104 = vmatprep.subr.bf16.mxu0 %v5103_v3  ;;  %v5119_v3 = vpack.c.bf16 %v386_v61, %v258_v60  ;;  %v391_v55 = vld [vmem:[#allocation5 + $0x6f0] sm:$0x3]  ;;  %v266_v60 = vld [vmem:[#allocation5 + $0x308] sm:$0xff] }
  0x67   :  { %v394_v61 = vld [vmem:[#allocation5 + $0x708] sm:$0x3] }
  0x6a   :  { %987 = vmatmul.mubr.f32.vlgmr.msra.gmra.mrb[0].mxu1 %v55_v10  ;;  %v63_v10 = vld [vmem:[#allocation2 + $0xb0] sm:$0xff] }
  0x6b   :  { %4978 = vmatpush1.bf16.xpose.msra.mxu1 %v4977_v11  ;;  %1056 = vmatprep.mubr.f32.mxu1 %v58_v16  ;;  %v4993_v11 = vpack.c.bf16 %v321_v5, %v193_v4  ;;  %v66_v16 = vld [vmem:[#allocation2 + $0xc8] sm:$0xff]  ;;  %v201_v4 = vld [vmem:[#allocation5 + $0x100] sm:$0xff] }
  0x6c   :  { %3227 = vmatmul.mubr.f32.vlgmr.msra.gmra.mrb[0].mxu0 %v119_v14  ;;  %4980 = vmatprep.subr.bf16.mxu1 %v4979_v17  ;;  %v127_v14 = vld [vmem:[#allocation2 + $0x2b0] sm:$0xff]  ;;  %v4995_v17 = vpack.c.bf16 %v324_v9, %v196_v8  ;;  %v329_v5 = vld [vmem:[#allocation5 + $0x500] sm:$0x3]  ;;  %v204_v8 = vld [vmem:[#allocation5 + $0x118] sm:$0xff] }
  0x6d   :  { %5106 = vmatpush1.bf16.xpose.msra.mxu0 %v5105_v15  ;;  %3296 = vmatprep.mubr.f32.mxu0 %v122_v18  ;;  %v5121_v15 = vpack.c.bf16 %v385_v7, %v257_v6  ;;  %v130_v18 = vld [vmem:[#allocation2 + $0x2c8] sm:$0xff]  ;;  %v265_v6 = vld [vmem:[#allocation5 + $0x300] sm:$0xff]  ;;  %v332_v9 = vld [vmem:[#allocation5 + $0x518] sm:$0x3] }
  0x6e   :  { %5108 = vmatprep.subr.bf16.mxu0 %v5107_v19  ;;  %v5123_v19 = vpack.c.bf16 %v388_v13, %v260_v12  ;;  %v393_v7 = vld [vmem:[#allocation5 + $0x700] sm:$0x3]  ;;  %v268_v12 = vld [vmem:[#allocation5 + $0x318] sm:$0xff] }
  0x6f   :  { %v396_v13 = vld [vmem:[#allocation5 + $0x718] sm:$0x3] }
  0x72   :  { %1057 = vmatmul.mubr.f32.vlgmr.msra.gmra.mrb[0].mxu1 %v57_v26  ;;  %v65_v26 = vld [vmem:[#allocation2 + $0xc0] sm:$0xff] }
  0x73   :  { %4982 = vmatpush1.bf16.xpose.msra.mxu1 %v4981_v27  ;;  %1126 = vmatprep.mubr.f32.mxu1 %v60_v32  ;;  %v4997_v27 = vpack.c.bf16 %v323_v21, %v195_v20  ;;  %v68_v32 = vld [vmem:[#allocation2 + $0xd8] sm:$0xff]  ;;  %v203_v20 = vld [vmem:[#allocation5 + $0x110] sm:$0xff] }
  0x74   :  { %3297 = vmatmul.mubr.f32.vlgmr.msra.gmra.mrb[0].mxu0 %v121_v30  ;;  %4984 = vmatprep.subr.bf16.mxu1 %v4983_v33  ;;  %v129_v30 = vld [vmem:[#allocation2 + $0x2c0] sm:$0xff]  ;;  %v4999_v33 = vpack.c.bf16 %v326_v25, %v198_v24  ;;  %v331_v21 = vld [vmem:[#allocation5 + $0x510] sm:$0x3]  ;;  %v206_v24 = vld [vmem:[#allocation5 + $0x128] sm:$0xff] }
  0x75   :  { %5110 = vmatpush1.bf16.xpose.msra.mxu0 %v5109_v31  ;;  %3366 = vmatprep.mubr.f32.mxu0 %v124_v34  ;;  %v5125_v31 = vpack.c.bf16 %v387_v23, %v259_v22  ;;  %v132_v34 = vld [vmem:[#allocation2 + $0x2d8] sm:$0xff]  ;;  %v267_v22 = vld [vmem:[#allocation5 + $0x310] sm:$0xff]  ;;  %v334_v25 = vld [vmem:[#allocation5 + $0x528] sm:$0x3] }
  0x76   :  { %5112 = vmatprep.subr.bf16.mxu0 %v5111_v35  ;;  %v5127_v35 = vpack.c.bf16 %v390_v29, %v262_v28  ;;  %v395_v23 = vld [vmem:[#allocation5 + $0x710] sm:$0x3]  ;;  %v270_v28 = vld [vmem:[#allocation5 + $0x328] sm:$0xff] }
  0x77   :  { %v398_v29 = vld [vmem:[#allocation5 + $0x728] sm:$0x3] }
  0x7a   :  { %1127 = vmatmul.mubr.f32.vlgmr.msra.gmra.mrb[0].mxu1 %v59_v42  ;;  %v67_v42 = vld [vmem:[#allocation2 + $0xd0] sm:$0xff] }
  0x7b   :  { %4986 = vmatpush1.bf16.xpose.msra.mxu1 %v4985_v43  ;;  %1196 = vmatprep.mubr.f32.mxu1 %v62_v48  ;;  %v5001_v43 = vpack.c.bf16 %v325_v37, %v197_v36  ;;  %v70_v48 = vld [vmem:[#allocation2 + $0xe8] sm:$0xff]  ;;  %v205_v36 = vld [vmem:[#allocation5 + $0x120] sm:$0xff] }
  0x7c   :  { %3367 = vmatmul.mubr.f32.vlgmr.msra.gmra.mrb[0].mxu0 %v123_v46  ;;  %4988 = vmatprep.subr.bf16.mxu1 %v4987_v49  ;;  %v131_v46 = vld [vmem:[#allocation2 + $0x2d0] sm:$0xff]  ;;  %v5003_v49 = vpack.c.bf16 %v328_v41, %v200_v40  ;;  %v333_v37 = vld [vmem:[#allocation5 + $0x520] sm:$0x3]  ;;  %v208_v40 = vld [vmem:[#allocation5 + $0x138] sm:$0xff] }
  0x7d   :  { %5114 = vmatpush1.bf16.xpose.msra.mxu0 %v5113_v47  ;;  %3436 = vmatprep.mubr.f32.mxu0 %v126_v50  ;;  %v5129_v47 = vpack.c.bf16 %v389_v39, %v261_v38  ;;  %v134_v50 = vld [vmem:[#allocation2 + $0x2e8] sm:$0xff]  ;;  %v269_v38 = vld [vmem:[#allocation5 + $0x320] sm:$0xff]  ;;  %v336_v41 = vld [vmem:[#allocation5 + $0x538] sm:$0x3] }
  0x7e   :  { %5116 = vmatprep.subr.bf16.mxu0 %v5115_v51  ;;  %v5131_v51 = vpack.c.bf16 %v392_v45, %v264_v44  ;;  %v397_v39 = vld [vmem:[#allocation5 + $0x720] sm:$0x3]  ;;  %v272_v44 = vld [vmem:[#allocation5 + $0x338] sm:$0xff] }
  0x7f   :  { %v400_v45 = vld [vmem:[#allocation5 + $0x738] sm:$0x3] }
  0x82   :  { %1197 = vmatmul.mubr.f32.vlgmr.msra.gmra.mrb[0].mxu1 %v61_v58  ;;  %v69_v58 = vld [vmem:[#allocation2 + $0xe0] sm:$0xff] }
  0x83   :  { %4990 = vmatpush1.bf16.xpose.msra.mxu1 %v4989_v59  ;;  %1266 = vmatprep.mubr.f32.mxu1 %v64_v0  ;;  %v5005_v59 = vpack.c.bf16 %v327_v53, %v199_v52  ;;  %v72_v0 = vld [vmem:[#allocation2 + $0xf8] sm:$0xff]  ;;  %v207_v52 = vld [vmem:[#allocation5 + $0x130] sm:$0xff] }
  0x84   :  { %3437 = vmatmul.mubr.f32.vlgmr.msra.gmra.mrb[0].mxu0 %v125_v62  ;;  %4992 = vmatprep.subr.bf16.mxu1 %v4991_v1  ;;  %v133_v62 = vld [vmem:[#allocation2 + $0x2e0] sm:$0xff]  ;;  %v5007_v1 = vpack.c.bf16 %v330_v57, %v202_v56  ;;  %v335_v53 = vld [vmem:[#allocation5 + $0x530] sm:$0x3]  ;;  %v210_v56 = vld [vmem:[#allocation5 + $0x148] sm:$0xff] }
  0x85   :  { %5118 = vmatpush1.bf16.xpose.msra.mxu0 %v5117_v63  ;;  %3506 = vmatprep.mubr.f32.mxu0 %v128_v2  ;;  %v5133_v63 = vpack.c.bf16 %v391_v55, %v263_v54  ;;  %v136_v2 = vld [vmem:[#allocation2 + $0x2f8] sm:$0xff]  ;;  %v271_v54 = vld [vmem:[#allocation5 + $0x330] sm:$0xff]  ;;  %v338_v57 = vld [vmem:[#allocation5 + $0x548] sm:$0x3] }
  0x86   :  { %5120 = vmatprep.subr.bf16.mxu0 %v5119_v3  ;;  %v5135_v3 = vpack.c.bf16 %v394_v61, %v266_v60  ;;  %v399_v55 = vld [vmem:[#allocation5 + $0x730] sm:$0x3]  ;;  %v274_v60 = vld [vmem:[#allocation5 + $0x348] sm:$0xff] }
  0x87   :  { %v402_v61 = vld [vmem:[#allocation5 + $0x748] sm:$0x3] }
  0x8a   :  { %1267 = vmatmul.mubr.f32.vlgmr.msra.gmra.mrb[0].mxu1 %v63_v10  ;;  %v71_v10 = vld [vmem:[#allocation2 + $0xf0] sm:$0xff] }
  0x8b   :  { %4994 = vmatpush1.bf16.xpose.msra.mxu1 %v4993_v11  ;;  %1336 = vmatprep.mubr.f32.mxu1 %v66_v16  ;;  %v5009_v11 = vpack.c.bf16 %v329_v5, %v201_v4  ;;  %v74_v16 = vld [vmem:[#allocation2 + $0x108] sm:$0xff]  ;;  %v209_v4 = vld [vmem:[#allocation5 + $0x140] sm:$0xff] }
  0x8c   :  { %3507 = vmatmul.mubr.f32.vlgmr.msra.gmra.mrb[0].mxu0 %v127_v14  ;;  %4996 = vmatprep.subr.bf16.mxu1 %v4995_v17  ;;  %v135_v14 = vld [vmem:[#allocation2 + $0x2f0] sm:$0xff]  ;;  %v5011_v17 = vpack.c.bf16 %v332_v9, %v204_v8  ;;  %v337_v5 = vld [vmem:[#allocation5 + $0x540] sm:$0x3]  ;;  %v212_v8 = vld [vmem:[#allocation5 + $0x158] sm:$0xff] }
  0x8d   :  { %5122 = vmatpush1.bf16.xpose.msra.mxu0 %v5121_v15  ;;  %3576 = vmatprep.mubr.f32.mxu0 %v130_v18  ;;  %v5137_v15 = vpack.c.bf16 %v393_v7, %v265_v6  ;;  %v138_v18 = vld [vmem:[#allocation2 + $0x308] sm:$0xff]  ;;  %v273_v6 = vld [vmem:[#allocation5 + $0x340] sm:$0xff]  ;;  %v340_v9 = vld [vmem:[#allocation5 + $0x558] sm:$0x3] }
  0x8e   :  { %5124 = vmatprep.subr.bf16.mxu0 %v5123_v19  ;;  %v5139_v19 = vpack.c.bf16 %v396_v13, %v268_v12  ;;  %v401_v7 = vld [vmem:[#allocation5 + $0x740] sm:$0x3]  ;;  %v276_v12 = vld [vmem:[#allocation5 + $0x358] sm:$0xff] }
  0x8f   :  { %v404_v13 = vld [vmem:[#allocation5 + $0x758] sm:$0x3] }
  0x92   :  { %1337 = vmatmul.mubr.f32.vlgmr.msra.gmra.mrb[0].mxu1 %v65_v26  ;;  %v73_v26 = vld [vmem:[#allocation2 + $0x100] sm:$0xff] }
  0x93   :  { %4998 = vmatpush1.bf16.xpose.msra.mxu1 %v4997_v27  ;;  %1406 = vmatprep.mubr.f32.mxu1 %v68_v32  ;;  %v5013_v27 = vpack.c.bf16 %v331_v21, %v203_v20  ;;  %v76_v32 = vld [vmem:[#allocation2 + $0x118] sm:$0xff]  ;;  %v211_v20 = vld [vmem:[#allocation5 + $0x150] sm:$0xff] }
  0x94   :  { %3577 = vmatmul.mubr.f32.vlgmr.msra.gmra.mrb[0].mxu0 %v129_v30  ;;  %5000 = vmatprep.subr.bf16.mxu1 %v4999_v33  ;;  %v137_v30 = vld [vmem:[#allocation2 + $0x300] sm:$0xff]  ;;  %v5015_v33 = vpack.c.bf16 %v334_v25, %v206_v24  ;;  %v339_v21 = vld [vmem:[#allocation5 + $0x550] sm:$0x3]  ;;  %v214_v24 = vld [vmem:[#allocation5 + $0x168] sm:$0xff] }
  0x95   :  { %5126 = vmatpush1.bf16.xpose.msra.mxu0 %v5125_v31  ;;  %3646 = vmatprep.mubr.f32.mxu0 %v132_v34  ;;  %v5141_v31 = vpack.c.bf16 %v395_v23, %v267_v22  ;;  %v140_v34 = vld [vmem:[#allocation2 + $0x318] sm:$0xff]  ;;  %v275_v22 = vld [vmem:[#allocation5 + $0x350] sm:$0xff]  ;;  %v342_v25 = vld [vmem:[#allocation5 + $0x568] sm:$0x3] }
  0x96   :  { %5128 = vmatprep.subr.bf16.mxu0 %v5127_v35  ;;  %v5143_v35 = vpack.c.bf16 %v398_v29, %v270_v28  ;;  %v403_v23 = vld [vmem:[#allocation5 + $0x750] sm:$0x3]  ;;  %v278_v28 = vld [vmem:[#allocation5 + $0x368] sm:$0xff] }
  0x97   :  { %v406_v29 = vld [vmem:[#allocation5 + $0x768] sm:$0x3] }
  0x9a   :  { %1407 = vmatmul.mubr.f32.vlgmr.msra.gmra.mrb[0].mxu1 %v67_v42  ;;  %v75_v42 = vld [vmem:[#allocation2 + $0x110] sm:$0xff] }
  0x9b   :  { %5002 = vmatpush1.bf16.xpose.msra.mxu1 %v5001_v43  ;;  %1476 = vmatprep.mubr.f32.mxu1 %v70_v48  ;;  %v5017_v43 = vpack.c.bf16 %v333_v37, %v205_v36  ;;  %v78_v48 = vld [vmem:[#allocation2 + $0x128] sm:$0xff]  ;;  %v213_v36 = vld [vmem:[#allocation5 + $0x160] sm:$0xff] }
  0x9c   :  { %3647 = vmatmul.mubr.f32.vlgmr.msra.gmra.mrb[0].mxu0 %v131_v46  ;;  %5004 = vmatprep.subr.bf16.mxu1 %v5003_v49  ;;  %v139_v46 = vld [vmem:[#allocation2 + $0x310] sm:$0xff]  ;;  %v5019_v49 = vpack.c.bf16 %v336_v41, %v208_v40  ;;  %v341_v37 = vld [vmem:[#allocation5 + $0x560] sm:$0x3]  ;;  %v216_v40 = vld [vmem:[#allocation5 + $0x178] sm:$0xff] }
  0x9d   :  { %5130 = vmatpush1.bf16.xpose.msra.mxu0 %v5129_v47  ;;  %3716 = vmatprep.mubr.f32.mxu0 %v134_v50  ;;  %v5145_v47 = vpack.c.bf16 %v397_v39, %v269_v38  ;;  %v142_v50 = vld [vmem:[#allocation2 + $0x328] sm:$0xff]  ;;  %v277_v38 = vld [vmem:[#allocation5 + $0x360] sm:$0xff]  ;;  %v344_v41 = vld [vmem:[#allocation5 + $0x578] sm:$0x3] }
  0x9e   :  { %5132 = vmatprep.subr.bf16.mxu0 %v5131_v51  ;;  %v5147_v51 = vpack.c.bf16 %v400_v45, %v272_v44  ;;  %v405_v39 = vld [vmem:[#allocation5 + $0x760] sm:$0x3]  ;;  %v280_v44 = vld [vmem:[#allocation5 + $0x378] sm:$0xff] }
  0x9f   :  { %v408_v45 = vld [vmem:[#allocation5 + $0x778] sm:$0x3] }
  0xa2   :  { %1477 = vmatmul.mubr.f32.vlgmr.msra.gmra.mrb[0].mxu1 %v69_v58  ;;  %v77_v58 = vld [vmem:[#allocation2 + $0x120] sm:$0xff] }
  0xa3   :  { %5006 = vmatpush1.bf16.xpose.msra.mxu1 %v5005_v59  ;;  %1546 = vmatprep.mubr.f32.mxu1 %v72_v0  ;;  %v5021_v59 = vpack.c.bf16 %v335_v53, %v207_v52  ;;  %v80_v0 = vld [vmem:[#allocation2 + $0x138] sm:$0xff]  ;;  %v215_v52 = vld [vmem:[#allocation5 + $0x170] sm:$0xff] }
  0xa4   :  { %3717 = vmatmul.mubr.f32.vlgmr.msra.gmra.mrb[0].mxu0 %v133_v62  ;;  %5008 = vmatprep.subr.bf16.mxu1 %v5007_v1  ;;  %v141_v62 = vld [vmem:[#allocation2 + $0x320] sm:$0xff]  ;;  %v5023_v1 = vpack.c.bf16 %v338_v57, %v210_v56  ;;  %v343_v53 = vld [vmem:[#allocation5 + $0x570] sm:$0x3]  ;;  %v218_v56 = vld [vmem:[#allocation5 + $0x188] sm:$0xff] }
  0xa5   :  { %5134 = vmatpush1.bf16.xpose.msra.mxu0 %v5133_v63  ;;  %3786 = vmatprep.mubr.f32.mxu0 %v136_v2  ;;  %v5149_v63 = vpack.c.bf16 %v399_v55, %v271_v54  ;;  %v144_v2 = vld [vmem:[#allocation2 + $0x338] sm:$0xff]  ;;  %v279_v54 = vld [vmem:[#allocation5 + $0x370] sm:$0xff]  ;;  %v346_v57 = vld [vmem:[#allocation5 + $0x588] sm:$0x3] }
  0xa6   :  { %5136 = vmatprep.subr.bf16.mxu0 %v5135_v3  ;;  %v5151_v3 = vpack.c.bf16 %v402_v61, %v274_v60  ;;  %v407_v55 = vld [vmem:[#allocation5 + $0x770] sm:$0x3]  ;;  %v282_v60 = vld [vmem:[#allocation5 + $0x388] sm:$0xff] }
  0xa7   :  { %v410_v61 = vld [vmem:[#allocation5 + $0x788] sm:$0x3] }
  0xaa   :  { %1547 = vmatmul.mubr.f32.vlgmr.msra.gmra.mrb[0].mxu1 %v71_v10  ;;  %v79_v10 = vld [vmem:[#allocation2 + $0x130] sm:$0xff] }
  0xab   :  { %5010 = vmatpush1.bf16.xpose.msra.mxu1 %v5009_v11  ;;  %1616 = vmatprep.mubr.f32.mxu1 %v74_v16  ;;  %v5025_v11 = vpack.c.bf16 %v337_v5, %v209_v4  ;;  %v82_v16 = vld [vmem:[#allocation2 + $0x148] sm:$0xff]  ;;  %v217_v4 = vld [vmem:[#allocation5 + $0x180] sm:$0xff] }
  0xac   :  { %3787 = vmatmul.mubr.f32.vlgmr.msra.gmra.mrb[0].mxu0 %v135_v14  ;;  %5012 = vmatprep.subr.bf16.mxu1 %v5011_v17  ;;  %v143_v14 = vld [vmem:[#allocation2 + $0x330] sm:$0xff]  ;;  %v5027_v17 = vpack.c.bf16 %v340_v9, %v212_v8  ;;  %v345_v5 = vld [vmem:[#allocation5 + $0x580] sm:$0x3]  ;;  %v220_v8 = vld [vmem:[#allocation5 + $0x198] sm:$0xff] }
  0xad   :  { %5138 = vmatpush1.bf16.xpose.msra.mxu0 %v5137_v15  ;;  %3856 = vmatprep.mubr.f32.mxu0 %v138_v18  ;;  %v5153_v15 = vpack.c.bf16 %v401_v7, %v273_v6  ;;  %v146_v18 = vld [vmem:[#allocation2 + $0x348] sm:$0xff]  ;;  %v281_v6 = vld [vmem:[#allocation5 + $0x380] sm:$0xff]  ;;  %v348_v9 = vld [vmem:[#allocation5 + $0x598] sm:$0x3] }
  0xae   :  { %5140 = vmatprep.subr.bf16.mxu0 %v5139_v19  ;;  %v5155_v19 = vpack.c.bf16 %v404_v13, %v276_v12  ;;  %v409_v7 = vld [vmem:[#allocation5 + $0x780] sm:$0x3]  ;;  %v284_v12 = vld [vmem:[#allocation5 + $0x398] sm:$0xff] }
  0xaf   :  { %v412_v13 = vld [vmem:[#allocation5 + $0x798] sm:$0x3] }
  0xb2   :  { %1617 = vmatmul.mubr.f32.vlgmr.msra.gmra.mrb[0].mxu1 %v73_v26  ;;  %v81_v26 = vld [vmem:[#allocation2 + $0x140] sm:$0xff] }
  0xb3   :  { %5014 = vmatpush1.bf16.xpose.msra.mxu1 %v5013_v27  ;;  %1686 = vmatprep.mubr.f32.mxu1 %v76_v32  ;;  %v5029_v27 = vpack.c.bf16 %v339_v21, %v211_v20  ;;  %v84_v32 = vld [vmem:[#allocation2 + $0x158] sm:$0xff]  ;;  %v219_v20 = vld [vmem:[#allocation5 + $0x190] sm:$0xff] }
  0xb4   :  { %3857 = vmatmul.mubr.f32.vlgmr.msra.gmra.mrb[0].mxu0 %v137_v30  ;;  %5016 = vmatprep.subr.bf16.mxu1 %v5015_v33  ;;  %v145_v30 = vld [vmem:[#allocation2 + $0x340] sm:$0xff]  ;;  %v5031_v33 = vpack.c.bf16 %v342_v25, %v214_v24  ;;  %v347_v21 = vld [vmem:[#allocation5 + $0x590] sm:$0x3]  ;;  %v222_v24 = vld [vmem:[#allocation5 + $0x1a8] sm:$0xff] }
  0xb5   :  { %5142 = vmatpush1.bf16.xpose.msra.mxu0 %v5141_v31  ;;  %3926 = vmatprep.mubr.f32.mxu0 %v140_v34  ;;  %v5157_v31 = vpack.c.bf16 %v403_v23, %v275_v22  ;;  %v148_v34 = vld [vmem:[#allocation2 + $0x358] sm:$0xff]  ;;  %v283_v22 = vld [vmem:[#allocation5 + $0x390] sm:$0xff]  ;;  %v350_v25 = vld [vmem:[#allocation5 + $0x5a8] sm:$0x3] }
  0xb6   :  { %5144 = vmatprep.subr.bf16.mxu0 %v5143_v35  ;;  %v5159_v35 = vpack.c.bf16 %v406_v29, %v278_v28  ;;  %v411_v23 = vld [vmem:[#allocation5 + $0x790] sm:$0x3]  ;;  %v286_v28 = vld [vmem:[#allocation5 + $0x3a8] sm:$0xff] }
  0xb7   :  { %v414_v29 = vld [vmem:[#allocation5 + $0x7a8] sm:$0x3] }
  0xba   :  { %1687 = vmatmul.mubr.f32.vlgmr.msra.gmra.mrb[0].mxu1 %v75_v42  ;;  %v83_v42 = vld [vmem:[#allocation2 + $0x150] sm:$0xff] }
  0xbb   :  { %5018 = vmatpush1.bf16.xpose.msra.mxu1 %v5017_v43  ;;  %1756 = vmatprep.mubr.f32.mxu1 %v78_v48  ;;  %v5033_v43 = vpack.c.bf16 %v341_v37, %v213_v36  ;;  %v86_v48 = vld [vmem:[#allocation2 + $0x168] sm:$0xff]  ;;  %v221_v36 = vld [vmem:[#allocation5 + $0x1a0] sm:$0xff] }
  0xbc   :  { %3927 = vmatmul.mubr.f32.vlgmr.msra.gmra.mrb[0].mxu0 %v139_v46  ;;  %5020 = vmatprep.subr.bf16.mxu1 %v5019_v49  ;;  %v147_v46 = vld [vmem:[#allocation2 + $0x350] sm:$0xff]  ;;  %v5035_v49 = vpack.c.bf16 %v344_v41, %v216_v40  ;;  %v349_v37 = vld [vmem:[#allocation5 + $0x5a0] sm:$0x3]  ;;  %v224_v40 = vld [vmem:[#allocation5 + $0x1b8] sm:$0xff] }
  0xbd   :  { %5146 = vmatpush1.bf16.xpose.msra.mxu0 %v5145_v47  ;;  %3996 = vmatprep.mubr.f32.mxu0 %v142_v50  ;;  %v5161_v47 = vpack.c.bf16 %v405_v39, %v277_v38  ;;  %v150_v50 = vld [vmem:[#allocation2 + $0x368] sm:$0xff]  ;;  %v285_v38 = vld [vmem:[#allocation5 + $0x3a0] sm:$0xff]  ;;  %v352_v41 = vld [vmem:[#allocation5 + $0x5b8] sm:$0x3] }
  0xbe   :  { %5148 = vmatprep.subr.bf16.mxu0 %v5147_v51  ;;  %v5163_v51 = vpack.c.bf16 %v408_v45, %v280_v44  ;;  %v413_v39 = vld [vmem:[#allocation5 + $0x7a0] sm:$0x3]  ;;  %v288_v44 = vld [vmem:[#allocation5 + $0x3b8] sm:$0xff] }
  0xbf   :  { %v416_v45 = vld [vmem:[#allocation5 + $0x7b8] sm:$0x3] }
  0xc2   :  { %1757 = vmatmul.mubr.f32.vlgmr.msra.gmra.mrb[0].mxu1 %v77_v58  ;;  %v85_v58 = vld [vmem:[#allocation2 + $0x160] sm:$0xff] }
  0xc3   :  { %5022 = vmatpush1.bf16.xpose.msra.mxu1 %v5021_v59  ;;  %1826 = vmatprep.mubr.f32.mxu1 %v80_v0  ;;  %v5037_v59 = vpack.c.bf16 %v343_v53, %v215_v52  ;;  %v88_v0 = vld [vmem:[#allocation2 + $0x178] sm:$0xff]  ;;  %v223_v52 = vld [vmem:[#allocation5 + $0x1b0] sm:$0xff] }
  0xc4   :  { %3997 = vmatmul.mubr.f32.vlgmr.msra.gmra.mrb[0].mxu0 %v141_v62  ;;  %5024 = vmatprep.subr.bf16.mxu1 %v5023_v1  ;;  %v149_v62 = vld [vmem:[#allocation2 + $0x360] sm:$0xff]  ;;  %v5039_v1 = vpack.c.bf16 %v346_v57, %v218_v56  ;;  %v351_v53 = vld [vmem:[#allocation5 + $0x5b0] sm:$0x3]  ;;  %v226_v56 = vld [vmem:[#allocation5 + $0x1c8] sm:$0xff] }
  0xc5   :  { %5150 = vmatpush1.bf16.xpose.msra.mxu0 %v5149_v63  ;;  %4066 = vmatprep.mubr.f32.mxu0 %v144_v2  ;;  %v5165_v63 = vpack.c.bf16 %v407_v55, %v279_v54  ;;  %v152_v2 = vld [vmem:[#allocation2 + $0x378] sm:$0xff]  ;;  %v287_v54 = vld [vmem:[#allocation5 + $0x3b0] sm:$0xff]  ;;  %v354_v57 = vld [vmem:[#allocation5 + $0x5c8] sm:$0x3] }
  0xc6   :  { %5152 = vmatprep.subr.bf16.mxu0 %v5151_v3  ;;  %v5167_v3 = vpack.c.bf16 %v410_v61, %v282_v60  ;;  %v415_v55 = vld [vmem:[#allocation5 + $0x7b0] sm:$0x3]  ;;  %v290_v60 = vld [vmem:[#allocation5 + $0x3c8] sm:$0xff] }
  0xc7   :  { %v418_v61 = vld [vmem:[#allocation5 + $0x7c8] sm:$0x3] }
  0xca   :  { %1827 = vmatmul.mubr.f32.vlgmr.msra.gmra.mrb[0].mxu1 %v79_v10  ;;  %v87_v10 = vld [vmem:[#allocation2 + $0x170] sm:$0xff] }
  0xcb   :  { %5026 = vmatpush1.bf16.xpose.msra.mxu1 %v5025_v11  ;;  %1896 = vmatprep.mubr.f32.mxu1 %v82_v16  ;;  %v5041_v11 = vpack.c.bf16 %v345_v5, %v217_v4  ;;  %v90_v16 = vld [vmem:[#allocation2 + $0x188] sm:$0xff]  ;;  %v225_v4 = vld [vmem:[#allocation5 + $0x1c0] sm:$0xff] }
  0xcc   :  { %4067 = vmatmul.mubr.f32.vlgmr.msra.gmra.mrb[0].mxu0 %v143_v14  ;;  %5028 = vmatprep.subr.bf16.mxu1 %v5027_v17  ;;  %v151_v14 = vld [vmem:[#allocation2 + $0x370] sm:$0xff]  ;;  %v5043_v17 = vpack.c.bf16 %v348_v9, %v220_v8  ;;  %v353_v5 = vld [vmem:[#allocation5 + $0x5c0] sm:$0x3]  ;;  %v228_v8 = vld [vmem:[#allocation5 + $0x1d8] sm:$0xff] }
  0xcd   :  { %5154 = vmatpush1.bf16.xpose.msra.mxu0 %v5153_v15  ;;  %4136 = vmatprep.mubr.f32.mxu0 %v146_v18  ;;  %v5169_v15 = vpack.c.bf16 %v409_v7, %v281_v6  ;;  %v154_v18 = vld [vmem:[#allocation2 + $0x388] sm:$0xff]  ;;  %v289_v6 = vld [vmem:[#allocation5 + $0x3c0] sm:$0xff]  ;;  %v356_v9 = vld [vmem:[#allocation5 + $0x5d8] sm:$0x3] }
  0xce   :  { %5156 = vmatprep.subr.bf16.mxu0 %v5155_v19  ;;  %v5171_v19 = vpack.c.bf16 %v412_v13, %v284_v12  ;;  %v417_v7 = vld [vmem:[#allocation5 + $0x7c0] sm:$0x3]  ;;  %v292_v12 = vld [vmem:[#allocation5 + $0x3d8] sm:$0xff] }
  0xcf   :  { %v420_v13 = vld [vmem:[#allocation5 + $0x7d8] sm:$0x3] }
  0xd2   :  { %1897 = vmatmul.mubr.f32.vlgmr.msra.gmra.mrb[0].mxu1 %v81_v26  ;;  %v89_v26 = vld [vmem:[#allocation2 + $0x180] sm:$0xff] }
  0xd3   :  { %5030 = vmatpush1.bf16.xpose.msra.mxu1 %v5029_v27  ;;  %1966 = vmatprep.mubr.f32.mxu1 %v84_v32  ;;  %v5045_v27 = vpack.c.bf16 %v347_v21, %v219_v20  ;;  %v92_v32 = vld [vmem:[#allocation2 + $0x198] sm:$0xff]  ;;  %v227_v20 = vld [vmem:[#allocation5 + $0x1d0] sm:$0xff] }
  0xd4   :  { %4137 = vmatmul.mubr.f32.vlgmr.msra.gmra.mrb[0].mxu0 %v145_v30  ;;  %5032 = vmatprep.subr.bf16.mxu1 %v5031_v33  ;;  %v153_v30 = vld [vmem:[#allocation2 + $0x380] sm:$0xff]  ;;  %v5047_v33 = vpack.c.bf16 %v350_v25, %v222_v24  ;;  %v355_v21 = vld [vmem:[#allocation5 + $0x5d0] sm:$0x3]  ;;  %v230_v24 = vld [vmem:[#allocation5 + $0x1e8] sm:$0xff] }
  0xd5   :  { %5158 = vmatpush1.bf16.xpose.msra.mxu0 %v5157_v31  ;;  %4206 = vmatprep.mubr.f32.mxu0 %v148_v34  ;;  %v5173_v31 = vpack.c.bf16 %v411_v23, %v283_v22  ;;  %v156_v34 = vld [vmem:[#allocation2 + $0x398] sm:$0xff]  ;;  %v291_v22 = vld [vmem:[#allocation5 + $0x3d0] sm:$0xff]  ;;  %v358_v25 = vld [vmem:[#allocation5 + $0x5e8] sm:$0x3] }
  0xd6   :  { %5160 = vmatprep.subr.bf16.mxu0 %v5159_v35  ;;  %v5175_v35 = vpack.c.bf16 %v414_v29, %v286_v28  ;;  %v419_v23 = vld [vmem:[#allocation5 + $0x7d0] sm:$0x3]  ;;  %v294_v28 = vld [vmem:[#allocation5 + $0x3e8] sm:$0xff] }
  0xd7   :  { %v422_v29 = vld [vmem:[#allocation5 + $0x7e8] sm:$0x3] }
  0xda   :  { %1967 = vmatmul.mubr.f32.vlgmr.msra.gmra.mrb[0].mxu1 %v83_v42  ;;  %v91_v42 = vld [vmem:[#allocation2 + $0x190] sm:$0xff] }
  0xdb   :  { %5034 = vmatpush1.bf16.xpose.msra.mxu1 %v5033_v43  ;;  %2036 = vmatprep.mubr.f32.mxu1 %v86_v48  ;;  %v5049_v43 = vpack.c.bf16 %v349_v37, %v221_v36  ;;  %v94_v48 = vld [vmem:[#allocation2 + $0x1a8] sm:$0xff]  ;;  %v229_v36 = vld [vmem:[#allocation5 + $0x1e0] sm:$0xff] }
  0xdc   :  { %4207 = vmatmul.mubr.f32.vlgmr.msra.gmra.mrb[0].mxu0 %v147_v46  ;;  %5036 = vmatprep.subr.bf16.mxu1 %v5035_v49  ;;  %v155_v46 = vld [vmem:[#allocation2 + $0x390] sm:$0xff]  ;;  %v5051_v49 = vpack.c.bf16 %v352_v41, %v224_v40  ;;  %v357_v37 = vld [vmem:[#allocation5 + $0x5e0] sm:$0x3]  ;;  %v232_v40 = vld [vmem:[#allocation5 + $0x1f8] sm:$0xff] }
  0xdd   :  { %5162 = vmatpush1.bf16.xpose.msra.mxu0 %v5161_v47  ;;  %4276 = vmatprep.mubr.f32.mxu0 %v150_v50  ;;  %v5177_v47 = vpack.c.bf16 %v413_v39, %v285_v38  ;;  %v158_v50 = vld [vmem:[#allocation2 + $0x3a8] sm:$0xff]  ;;  %v293_v38 = vld [vmem:[#allocation5 + $0x3e0] sm:$0xff]  ;;  %v360_v41 = vld [vmem:[#allocation5 + $0x5f8] sm:$0x3] }
  0xde   :  { %5164 = vmatprep.subr.bf16.mxu0 %v5163_v51  ;;  %v5179_v51 = vpack.c.bf16 %v416_v45, %v288_v44  ;;  %v421_v39 = vld [vmem:[#allocation5 + $0x7e0] sm:$0x3]  ;;  %v296_v44 = vld [vmem:[#allocation5 + $0x3f8] sm:$0xff] }
  0xdf   :  { %v424_v45 = vld [vmem:[#allocation5 + $0x7f8] sm:$0x3] }
  0xe2   :  { %2037 = vmatmul.mubr.f32.vlgmr.msra.gmra.mrb[0].mxu1 %v85_v58  ;;  %v93_v58 = vld [vmem:[#allocation2 + $0x1a0] sm:$0xff] }
  0xe3   :  { %5038 = vmatpush1.bf16.xpose.msra.mxu1 %v5037_v59  ;;  %2106 = vmatprep.mubr.f32.mxu1 %v88_v0  ;;  %v5053_v59 = vpack.c.bf16 %v351_v53, %v223_v52  ;;  %v96_v0 = vld [vmem:[#allocation2 + $0x1b8] sm:$0xff]  ;;  %v231_v52 = vld [vmem:[#allocation5 + $0x1f0] sm:$0xff] }
  0xe4   :  { %4277 = vmatmul.mubr.f32.vlgmr.msra.gmra.mrb[0].mxu0 %v149_v62  ;;  %5040 = vmatprep.subr.bf16.mxu1 %v5039_v1  ;;  %v157_v62 = vld [vmem:[#allocation2 + $0x3a0] sm:$0xff]  ;;  %v5055_v1 = vpack.c.bf16 %v354_v57, %v226_v56  ;;  %v359_v53 = vld [vmem:[#allocation5 + $0x5f0] sm:$0x3] }
  0xe5   :  { %5166 = vmatpush1.bf16.xpose.msra.mxu0 %v5165_v63  ;;  %4346 = vmatprep.mubr.f32.mxu0 %v152_v2  ;;  %v5181_v63 = vpack.c.bf16 %v415_v55, %v287_v54  ;;  %v160_v2 = vld [vmem:[#allocation2 + $0x3b8] sm:$0xff]  ;;  %v295_v54 = vld [vmem:[#allocation5 + $0x3f0] sm:$0xff]  ;;  %v101_v56 = vld [vmem:[#allocation2 + $0x1e0] sm:$0xff]  ;;  %v5069_v57 = vpack.c.bf16 %v359_v53, %v231_v52 }
  0xe6   :  { %5168 = vmatprep.subr.bf16.mxu0 %v5167_v3  ;;  %v5183_v3 = vpack.c.bf16 %v418_v61, %v290_v60  ;;  %v423_v55 = vld [vmem:[#allocation5 + $0x7f0] sm:$0x3]  ;;  %v104_v60 = vld [vmem:[#allocation2 + $0x1f8] sm:$0xff] }
  0xe7   :  { %v168_v61 = vld [vmem:[#allocation2 + $0x3f8] sm:$0xff] }
  0xea   :  { %2107 = vmatmul.mubr.f32.vlgmr.msra.gmra.mrb[0].mxu1 %v87_v10  ;;  %v95_v10 = vld [vmem:[#allocation2 + $0x1b0] sm:$0xff] }
  0xeb   :  { %5042 = vmatpush1.bf16.xpose.msra.mxu1 %v5041_v11  ;;  %2176 = vmatprep.mubr.f32.mxu1 %v90_v16  ;;  %v5057_v11 = vpack.c.bf16 %v353_v5, %v225_v4  ;;  %v98_v16 = vld [vmem:[#allocation2 + $0x1c8] sm:$0xff] }
  0xec   :  { %4347 = vmatmul.mubr.f32.vlgmr.msra.gmra.mrb[0].mxu0 %v151_v14  ;;  %5044 = vmatprep.subr.bf16.mxu1 %v5043_v17  ;;  %v159_v14 = vld [vmem:[#allocation2 + $0x3b0] sm:$0xff]  ;;  %v5059_v17 = vpack.c.bf16 %v356_v9, %v228_v8 }
  0xed   :  { %5170 = vmatpush1.bf16.xpose.msra.mxu0 %v5169_v15  ;;  %4416 = vmatprep.mubr.f32.mxu0 %v154_v18  ;;  %v5185_v15 = vpack.c.bf16 %v417_v7, %v289_v6  ;;  %v162_v18 = vld [vmem:[#allocation2 + $0x3c8] sm:$0xff] }
  0xee   :  { %5172 = vmatprep.subr.bf16.mxu0 %v5171_v19  ;;  %v5187_v19 = vpack.c.bf16 %v420_v13, %v292_v12 }
  0xf2   :  { %2177 = vmatmul.mubr.f32.vlgmr.msra.gmra.mrb[0].mxu1 %v89_v26  ;;  %v97_v26 = vld [vmem:[#allocation2 + $0x1c0] sm:$0xff] }
  0xf3   :  { %5046 = vmatpush1.bf16.xpose.msra.mxu1 %v5045_v27  ;;  %2246 = vmatprep.mubr.f32.mxu1 %v92_v32  ;;  %v5061_v27 = vpack.c.bf16 %v355_v21, %v227_v20  ;;  %v100_v32 = vld [vmem:[#allocation2 + $0x1d8] sm:$0xff] }
  0xf4   :  { %4417 = vmatmul.mubr.f32.vlgmr.msra.gmra.mrb[0].mxu0 %v153_v30  ;;  %5048 = vmatprep.subr.bf16.mxu1 %v5047_v33  ;;  %v161_v30 = vld [vmem:[#allocation2 + $0x3c0] sm:$0xff]  ;;  %v5063_v33 = vpack.c.bf16 %v358_v25, %v230_v24 }
  0xf5   :  { %5174 = vmatpush1.bf16.xpose.msra.mxu0 %v5173_v31  ;;  %4486 = vmatprep.mubr.f32.mxu0 %v156_v34  ;;  %v5189_v31 = vpack.c.bf16 %v419_v23, %v291_v22  ;;  %v164_v34 = vld [vmem:[#allocation2 + $0x3d8] sm:$0xff] }
  0xf6   :  { %5176 = vmatprep.subr.bf16.mxu0 %v5175_v35  ;;  %v5191_v35 = vpack.c.bf16 %v422_v29, %v294_v28 }
  0xfa   :  { %2247 = vmatmul.mubr.f32.vlgmr.msra.gmra.mrb[0].mxu1 %v91_v42  ;;  %v99_v42 = vld [vmem:[#allocation2 + $0x1d0] sm:$0xff] }
  0xfb   :  { %5050 = vmatpush1.bf16.xpose.msra.mxu1 %v5049_v43  ;;  %2316 = vmatprep.mubr.f32.mxu1 %v94_v48  ;;  %v5065_v43 = vpack.c.bf16 %v357_v37, %v229_v36  ;;  %v102_v48 = vld [vmem:[#allocation2 + $0x1e8] sm:$0xff] }
  0xfc   :  { %4487 = vmatmul.mubr.f32.vlgmr.msra.gmra.mrb[0].mxu0 %v155_v46  ;;  %5052 = vmatprep.subr.bf16.mxu1 %v5051_v49  ;;  %v163_v46 = vld [vmem:[#allocation2 + $0x3d0] sm:$0xff]  ;;  %v5067_v49 = vpack.c.bf16 %v360_v41, %v232_v40 }
  0xfd   :  { %5178 = vmatpush1.bf16.xpose.msra.mxu0 %v5177_v47  ;;  %4556 = vmatprep.mubr.f32.mxu0 %v158_v50  ;;  %v5193_v47 = vpack.c.bf16 %v421_v39, %v293_v38  ;;  %v166_v50 = vld [vmem:[#allocation2 + $0x3e8] sm:$0xff] }
  0xfe   :  { %5180 = vmatprep.subr.bf16.mxu0 %v5179_v51  ;;  %v5195_v51 = vpack.c.bf16 %v424_v45, %v296_v44 }
 0x102   :  { %2317 = vmatmul.mubr.f32.vlgmr.msra.gmra.mrb[0].mxu1 %v93_v58  ;;  %v165_v58 = vld [vmem:[#allocation2 + $0x3e0] sm:$0xff] }
 0x103   :  { %5054 = vmatpush1.bf16.xpose.msra.mxu1 %v5053_v59  ;;  %2386 = vmatprep.mubr.f32.mxu1 %v96_v0  ;;  %v5197_v59 = vpack.c.bf16 %v423_v55, %v295_v54  ;;  %v4942_v0 = vld [vmem:[%s5482_s2] ss:$0 sm:$0xff]  ;;  %s5410_s2 = smov [#allocation7]  }
 0x104   :  { %4557 = vmatmul.mubr.f32.vlgmr.msra.gmra.mrb[0].mxu0 %v157_v62  ;;  %5056 = vmatprep.subr.bf16.mxu1 %v5055_v1  ;;  %v103_v62 = vld [vmem:[#allocation2 + $0x1f0] sm:$0xff]  ;;  %s4932_s11 = sshll.u32 %s5410_s2, 4  ;;  %s4933_s11 = int_to_ptr.vmem [resolvable:$true] %s4932_s11 }
 0x105   :  { %5182 = vmatpush1.bf16.xpose.msra.mxu0 %v5181_v63  ;;  %4626 = vmatprep.mubr.f32.mxu0 %v160_v2  ;;  %v167_v63 = vld [vmem:[#allocation2 + $0x3f0] sm:$0xff]  ;;  %s5378_s12 = scalar_lea.vmem %s4933_s11, 128  ;;  %p5383_p3 = scmp.lt.s32.totalorder %s4933_s11, %s4933_s11 }
 0x106   :  { %5184 = vmatprep.subr.bf16.mxu0 %v5183_v3  ;;  %p5379_p2 = scmp.ne.s32.totalorder %s4933_s11, %s5378_s12  ;;  %p5384_p4 = scmp.lt.s32.totalorder %s5378_s12, %s5378_s12 }
 0x108   :  { %p5385_p5 = por %p5384_p4, %p5383_p3 }
 0x10a   :  { %2387 = vmatmul.mubr.f32.vlgmr.msra.gmra.mrb[0].mxu1 %v95_v10  ;;  %p5386_p6 = pnand %p5385_p5, %p5379_p2 }
 0x10b   :  { %5058 = vmatpush1.bf16.xpose.msra.mxu1 %v5057_v11  ;;  %2456 = vmatprep.mubr.f32.mxu1 %v98_v16 }
 0x10c   :  { %4627 = vmatmul.mubr.f32.vlgmr.msra.gmra.mrb[0].mxu0 %v159_v14  ;;  %5060 = vmatprep.subr.bf16.mxu1 %v5059_v17 }
 0x10d   :  { %5186 = vmatpush1.bf16.xpose.msra.mxu0 %v5185_v15  ;;  %4696 = vmatprep.mubr.f32.mxu0 %v162_v18 }
 0x10e   :  { %5188 = vmatprep.subr.bf16.mxu0 %v5187_v19 }
 0x112   :  { %2457 = vmatmul.mubr.f32.vlgmr.msra.gmra.mrb[0].mxu1 %v97_v26 }
 0x113   :  { %5062 = vmatpush1.bf16.xpose.msra.mxu1 %v5061_v27  ;;  %2526 = vmatprep.mubr.f32.mxu1 %v100_v32 }
 0x114   :  { %4697 = vmatmul.mubr.f32.vlgmr.msra.gmra.mrb[0].mxu0 %v161_v30  ;;  %5064 = vmatprep.subr.bf16.mxu1 %v5063_v33 }
 0x115   :  { %5190 = vmatpush1.bf16.xpose.msra.mxu0 %v5189_v31  ;;  %4766 = vmatprep.mubr.f32.mxu0 %v164_v34 }
 0x116   :  { %5192 = vmatprep.subr.bf16.mxu0 %v5191_v35 }
 0x11a   :  { %2527 = vmatmul.mubr.f32.vlgmr.msra.gmra.mrb[0].mxu1 %v99_v42 }
 0x11b   :  { %5066 = vmatpush1.bf16.xpose.msra.mxu1 %v5065_v43  ;;  %2596 = vmatprep.mubr.f32.mxu1 %v102_v48 }
 0x11c   :  { %4767 = vmatmul.mubr.f32.vlgmr.msra.gmra.mrb[0].mxu0 %v163_v46  ;;  %5068 = vmatprep.subr.bf16.mxu1 %v5067_v49 }
 0x11d   :  { %5194 = vmatpush1.bf16.xpose.msra.mxu0 %v5193_v47  ;;  %4836 = vmatprep.mubr.f32.mxu0 %v166_v50 }
 0x11e   :  { %5196 = vmatprep.subr.bf16.mxu0 %v5195_v51 }
 0x122   :  { %2597 = vmatmul.mubr.f32.vlgmr.msra.gmra.mrb[0].mxu1 %v101_v56 }
 0x123   :  { %5070 = vmatpush1.bf16.xpose.msra.mxu1 %v5069_v57  ;;  %2666 = vmatprep.mubr.f32.mxu1 %v104_v60 }
 0x124   :  { %4837 = vmatmul.mubr.f32.vlgmr.msra.gmra.mrb[0].mxu0 %v165_v58 }
 0x125   :  { %5198 = vmatpush1.bf16.xpose.msra.mxu0 %v5197_v59  ;;  %4906 = vmatprep.mubr.f32.mxu0 %v168_v61 }
 0x12a   :  { %2667 = vmatmul.mubr.f32.vlgmr.msra.gmra.mrb[0].mxu1 %v103_v62 }
 0x12c   :  { %4907 = vmatmul.mubr.f32.vlgmr.msra.gmra.mrb[0].mxu0 %v167_v63 }
 0x1fd   :  { %v2668_v1 = vpop.f32.mrb[0].mxu1 }
 0x1fe   :  { %v5199_v2 = vadd.f32 %v4942_v0, %v2668_v1  ;;  %v2670_v4 = vpop.f32.mrb[1].mxu1 }
 0x1ff   :  { %v4908_v3 = vpop.f32.mrb[0].mxu0 }
 0x200   :  { %v4910_v5 = vpop.f32.mrb[1].mxu0  ;;  %v5200_v6 = vadd.f32 %v5199_v2, %v4908_v3 }
 0x202   :  { %v4913_v7 = vsel %vm4912_vm0, %v5200_v6, -inf }
 0x203   :  { %4914 = vmax.xlane.f32.xlu0 %v4913_v7 }
 0x290   :  { %v4915_v8 = vpop.xlane.xlu0 %4914 }
 0x291   :  { %v4916_v9 = vsub.f32 %v5200_v6, %v4915_v8 }
 0x293   :  { %v4917_v10 = vmul.f32 1.442695, %v4916_v9 }
 0x295   :  { %5330 = vpow2.f32 %v4917_v10 }
 0x29f   :  { %v5331_v11 = vpop.eup %5330 }
 0x2a0   :  { %v4919_v12 = vsel %vm4912_vm0, %v5331_v11, 0.0 }
 0x2a1   :  { %4920 = vadd.xlane.f32.xlu0 %v4919_v12 }
 0x32e   :  { %v4921_v13 = vpop.xlane.xlu0 %4920 }
 0x32f   :  { %5332 = vlog2.f32 %v4921_v13 }
 0x339   :  { %v5333_v14 = vpop.eup %5332 }
 0x33a   :  { %v4923_v15 = vmul.f32 0.6931472, %v5333_v14 }
 0x33c   :  { %v4924_v16 = vsub.f32 %v4916_v9, %v4923_v15 }
 0x33e   :  { %4925 = vst.msk [vmem:[#allocation7] sm:$0xff] %vm4912_vm0, %v4924_v16 }
 0x33f   :  { %5389 = shalt.err (!%p5386_p6)
}
 0x340   :  { %s5390_s15 = scalar_lea.hbm %s5483_s3, 128 }
 0x341   :  { %p5391_p7 = scmp.ne.s32.totalorder %s5483_s3, %s5390_s15  ;;  %p5394_p8 = scmp.lt.u32.totalorder %s5390_s15, %s5483_s3 }
 0x343   :  { %p5396_p9 = pnand %p5394_p8, %p5391_p7 }
 0x345   :  { %5399 = shalt.err (!%p5396_p9)
}
 0x346   :  { %4935 = dma.vmem_to_hbm [thread:$0]  %s4933_s11, 128, %s5483_s3, [#allocation4]  }
 0x347   :  { %5404 = dma.done.wait [#allocation4], 128  }
 0x348   :  { %5405 = vsyncadd [#allocation4], 4294967168 }
 0x349   :  { %4939 = vsyncpa [#allocation3], 1 }
 0x34a   :  { %4940 = vsyncpa [#allocation6], 1 }
 0x34b   :  { %4941 = vsyncpa [#allocation4], 1 }

</bundles_post_ra>
